<compile_context>
chip_gen: v6e
topology: v6e:2x2x1
jax: 0.10.0
libtpu: 0.0.40
codegen_flags: <defaults>
</compile_context>

<pallas_src>
import functools
import math

import jax
import jax.numpy as jnp
from jax.experimental import pallas as pl
from jax.experimental.pallas import tpu as pltpu

EPS = 1e-5      # nn.BatchNorm1d default eps
LANE = 128      # lane width  -> feature padding
SUBLANE = 8     # sublane     -> batch padding


def _round_up(x, m):
    return (x + m - 1) // m * m


# ---------------------------- fused kernel ----------------------------

def _mlp_fused_kernel(x_ref, w_ref, b_ref, g_ref, beta_ref, o_ref, h_ref,
                      *, n_rows, n_layers):
    """One grid step == one layer.

    x_ref    : (Bp, H) bf16   padded input (same block every step; read at step 0)
    w_ref    : (H, H)  bf16   this layer's padded, pre-transposed weight
    b_ref    : (1, H)  f32    this layer's bias
    g_ref    : (1, H)  f32    BN gamma (unused on the last layer)
    beta_ref : (1, H)  f32    BN beta
    o_ref    : (Bp, H) f32    final output (written on the last step only)
    h_ref    : (Bp, H) bf16   VMEM-resident running activation
    """
    layer = pl.program_id(0)

    @pl.when(layer == 0)
    def _():
        h_ref[...] = x_ref[...]

    # Linear: bf16 operands, f32 accumulation on the MXU.
    y = jnp.dot(h_ref[...], w_ref[...], preferred_element_type=jnp.float32)
    y = y + b_ref[...]

    @pl.when(layer < n_layers - 1)
    def _():
        # BatchNorm1d (training-mode batch statistics, biased variance) + ReLU, in f32.
        # Padded batch rows are masked out of the statistics.
        row = jax.lax.broadcasted_iota(jnp.int32, y.shape, 0)
        mask = (row < n_rows).astype(jnp.float32)
        inv_n = 1.0 / n_rows
        mean = jnp.sum(y * mask, axis=0, keepdims=True) * inv_n
        d = y - mean                                   # centered once, reused
        var = jnp.sum(d * d * mask, axis=0, keepdims=True) * inv_n
        y_hat = d * jax.lax.rsqrt(var + EPS) * g_ref[...] + beta_ref[...]
        h_ref[...] = jnp.maximum(y_hat, 0.0).astype(h_ref.dtype)

    @pl.when(layer == n_layers - 1)
    def _():
        o_ref[...] = y


# ---------------------------- wrapper ----------------------------

def mlp_forward(params, x):
    """Fused Pallas forward. params = {"linears": [(W_t, b), ...], "bn": [(gamma, beta), ...]}."""
    L = len(params["linears"])
    if L == 0:                                # num_layers < 1  -> nn.Identity
        return x

    n, din0 = x.shape
    dims = [w.shape for (w, _) in params["linears"]]          # (din, dout) per layer
    dout_last = dims[-1][1]
    H = _round_up(max([din0] + [d for pair in dims for d in pair]), LANE)
    Bp = _round_up(n, SUBLANE)

    # Pack padded, stacked parameters (zero padding keeps the math exact).
    w_stack = jnp.zeros((L, H, H), jnp.bfloat16)
    b_stack = jnp.zeros((L, 1, H), jnp.float32)
    g_stack = jnp.zeros((L, 1, H), jnp.float32)
    beta_stack = jnp.zeros((L, 1, H), jnp.float32)
    for l, (w, b) in enumerate(params["linears"]):
        di, do = w.shape
        w_stack = w_stack.at[l, :di, :do].set(w.astype(jnp.bfloat16))
        b_stack = b_stack.at[l, 0, :do].set(b)
    for l, (g, bt) in enumerate(params["bn"]):
        g_stack = g_stack.at[l, 0, :g.shape[0]].set(g)
        beta_stack = beta_stack.at[l, 0, :bt.shape[0]].set(bt)

    x_pad = jnp.zeros((Bp, H), jnp.bfloat16).at[:n, :din0].set(x.astype(jnp.bfloat16))

    kernel = functools.partial(_mlp_fused_kernel, n_rows=n, n_layers=L)

    # VMEM budget: double-buffered inputs/output + scratch, with headroom.
    need = 2 * (H * H * 2 + Bp * H * 2 + Bp * H * 4 + 3 * H * 4) + Bp * H * 2
    vmem_limit = int(min(max(2 * need, 16 * 2**20), 64 * 2**20))

    out = pl.pallas_call(
        kernel,
        out_shape=jax.ShapeDtypeStruct((Bp, H), jnp.float32),
        grid_spec=pltpu.PrefetchScalarGridSpec(
            num_scalar_prefetch=0,
            grid=(L,),
            in_specs=[
                pl.BlockSpec((Bp, H), lambda l: (0, 0)),          # x (resident)
                pl.BlockSpec((None, H, H), lambda l: (l, 0, 0)),  # W_l (pipelined)
                pl.BlockSpec((None, 1, H), lambda l: (l, 0, 0)),  # b_l
                pl.BlockSpec((None, 1, H), lambda l: (l, 0, 0)),  # gamma_l
                pl.BlockSpec((None, 1, H), lambda l: (l, 0, 0)),  # beta_l
            ],
            out_specs=pl.BlockSpec((Bp, H), lambda l: (0, 0)),
            scratch_shapes=[pltpu.VMEM((Bp, H), jnp.bfloat16)],
        ),
        compiler_params=pltpu.CompilerParams(
            dimension_semantics=("arbitrary",),   # layer chain is sequential
            vmem_limit_bytes=vmem_limit,
        ),
    )(x_pad, w_stack, b_stack, g_stack, beta_stack)

    return out[:n, :dout_last]


# ---------------------------- params ----------------------------

def init_mlp_params(key, num_layers, input_dim, hidden_dim, output_dim):
    """Deterministic init mimicking nn.Linear default (U[-1/sqrt(fan_in), 1/sqrt(fan_in)]).
    Weights are stored pre-transposed as (in_features, out_features)."""
    params = {"linears": [], "bn": []}
    if num_layers < 1:
        return params
    if num_layers == 1:
        dims = [(input_dim, output_dim)]
    else:
        dims = ([(input_dim, hidden_dim)]
                + [(hidden_dim, hidden_dim)] * (num_layers - 2)
                + [(hidden_dim, output_dim)])
    for (din, dout) in dims:
        key, kw, kb = jax.random.split(key, 3)
        bound = 1.0 / math.sqrt(din)
        w_t = jax.random.uniform(kw, (din, dout), jnp.float32, -bound, bound)
        b = jax.random.uniform(kb, (dout,), jnp.float32, -bound, bound)
        params["linears"].append((w_t, b))
    for _ in range(num_layers - 1):
        params["bn"].append((jnp.ones((hidden_dim,), jnp.float32),
                             jnp.zeros((hidden_dim,), jnp.float32)))
    return params


# ---------------------------- plain-JAX reference ----------------------------

def mlp_forward_ref(params, x):
    """Mirrors the kernel's numerics (bf16 MXU operands, f32 accumulation, f32 BN/ReLU)."""
    L = len(params["linears"])
    if L == 0:
        return x
    h = x
    for l in range(L):
        w, b = params["linears"][l]
        y = jnp.dot(h.astype(jnp.bfloat16), w.astype(jnp.bfloat16),
                    preferred_element_type=jnp.float32) + b
        if l == L - 1:
            return y
        gamma, beta = params["bn"][l]
        mean = jnp.mean(y, axis=0, keepdims=True)
        d = y - mean
        var = jnp.mean(d * d, axis=0, keepdims=True)
        y = d * jax.lax.rsqrt(var + EPS) * gamma + beta
        h = jnp.maximum(y, 0.0).astype(jnp.bfloat16)


if __name__ == "__main__":
    num_layers, input_dim, hidden_dim, output_dim = 3, 16, 32, 8
    batch = 8

    key = jax.random.PRNGKey(0)
    kx, kp = jax.random.split(key)
    x = jax.random.normal(kx, (batch, input_dim), jnp.float32)
    params = init_mlp_params(kp, num_layers, input_dim, hidden_dim, output_dim)

    out = jax.block_until_ready(mlp_forward(params, x))
    ref = mlp_forward_ref(params, x)
    assert out.shape == (batch, output_dim)
    assert jnp.allclose(out, ref, atol=1e-3, rtol=1e-3), \
        float(jnp.max(jnp.abs(out - ref)))

    # num_layers == 1 path (single Linear, no BN)
    p1 = init_mlp_params(kp, 1, input_dim, hidden_dim, output_dim)
    o1 = jax.block_until_ready(mlp_forward(p1, x))
    r1 = mlp_forward_ref(p1, x)
    assert o1.shape == (batch, output_dim)
    assert jnp.allclose(o1, r1, atol=1e-3, rtol=1e-3)

    # num_layers < 1 path (nn.Identity)
    p0 = init_mlp_params(kp, 0, input_dim, hidden_dim, output_dim)
    o0 = mlp_forward(p0, x)
    assert o0.shape == x.shape and jnp.allclose(o0, x)

    print("KERNEL_OK")
</pallas_src>

<mosaic_0001>
module attributes {stable_mosaic.version = 11 : i64} {
  func.func @_mlp_fused_kernel(%arg0: i32, %arg1: memref<8x128xbf16, #tpu.memory_space<vmem>>, %arg2: memref<1x128x128xbf16, #tpu.memory_space<vmem>>, %arg3: memref<1x1x128xf32, #tpu.memory_space<vmem>>, %arg4: memref<1x1x128xf32, #tpu.memory_space<vmem>>, %arg5: memref<1x1x128xf32, #tpu.memory_space<vmem>>, %arg6: memref<8x128xf32, #tpu.memory_space<vmem>>, %arg7: memref<8x128xbf16, #tpu.memory_space<vmem>>) attributes {dimension_semantics = [#tpu.dimension_semantics<arbitrary>], iteration_bounds = array<i64: 3>, scalar_prefetch = 0 : i64, scratch_operands = 1 : i64, tpu.core_type = #tpu.core_type<tc>, window_params = [{pipeline_mode = #tpu.pipeline_mode<synchronous>, transform_indices = @transform_0, window_bounds = array<i64: 8, 128>}, {transform_indices = @transform_1, window_bounds = array<i64: 1, 128, 128>}, {transform_indices = @transform_2, window_bounds = array<i64: 1, 1, 128>}, {transform_indices = @transform_3, window_bounds = array<i64: 1, 1, 128>}, {transform_indices = @transform_4, window_bounds = array<i64: 1, 1, 128>}, {pipeline_mode = #tpu.pipeline_mode<synchronous>, transform_indices = @transform_5, window_bounds = array<i64: 8, 128>}]} {
    %c0_i32 = arith.constant 0 : i32
    %0 = arith.cmpi eq, %arg0, %c0_i32 : i32
    %1 = arith.extui %0 : i1 to i32
    %c0_i32_0 = arith.constant 0 : i32
    %2 = arith.cmpi ne, %1, %c0_i32_0 : i32
    scf.if %2 {
      %c0_11 = arith.constant 0 : index
      %c0_12 = arith.constant 0 : index
      %17 = vector.load %arg1[%c0_11, %c0_12] : memref<8x128xbf16, #tpu.memory_space<vmem>>, vector<8x128xbf16>
      %c0_13 = arith.constant 0 : index
      %c0_14 = arith.constant 0 : index
      %18 = vector.load %arg7[%c0_13, %c0_14] : memref<8x128xbf16, #tpu.memory_space<vmem>>, vector<8x128xbf16>
      tpu.vector_store %arg7[%c0_13, %c0_14], %17 {strides = array<i32>} : memref<8x128xbf16, #tpu.memory_space<vmem>>, vector<8x128xbf16>,
    } else {
    }
    %c0 = arith.constant 0 : index
    %c0_1 = arith.constant 0 : index
    %3 = vector.load %arg7[%c0, %c0_1] : memref<8x128xbf16, #tpu.memory_space<vmem>>, vector<8x128xbf16>
    %c0_2 = arith.constant 0 : index
    %c0_3 = arith.constant 0 : index
    %c0_4 = arith.constant 0 : index
    %4 = vector.load %arg2[%c0_2, %c0_3, %c0_4] : memref<1x128x128xbf16, #tpu.memory_space<vmem>>, vector<1x128x128xbf16>
    %5 = vector.shape_cast %4 : vector<1x128x128xbf16> to vector<128x128xbf16>
    %cst = arith.constant dense<0.000000e+00> : vector<8x128xf32>
    %6 = tpu.matmul %3, %5, %cst {dimension_numbers = #tpu.dot_dimension_numbers<[1], [0], [0], [1], [0, 0, 1, 1], [], []>} : vector<8x128xbf16>, vector<128x128xbf16>, vector<8x128xf32> -> vector<8x128xf32>
    %c0_5 = arith.constant 0 : index
    %c0_6 = arith.constant 0 : index
    %c0_7 = arith.constant 0 : index
    %7 = vector.load %arg3[%c0_5, %c0_6, %c0_7] : memref<1x1x128xf32, #tpu.memory_space<vmem>>, vector<1x1x128xf32>
    %8 = vector.shape_cast %7 : vector<1x1x128xf32> to vector<1x128xf32>
    %9 = vector.broadcast %8 : vector<1x128xf32> to vector<8x128xf32>
    %10 = arith.addf %6, %9 : vector<8x128xf32>
    %c2_i32 = arith.constant 2 : i32
    %11 = arith.cmpi slt, %arg0, %c2_i32 : i32
    %12 = arith.extui %11 : i1 to i32
    %c0_i32_8 = arith.constant 0 : i32
    %13 = arith.cmpi ne, %12, %c0_i32_8 : i32
    scf.if %13 {
      %17 = tpu.iota {dimensions = array<i32: 0>} : vector<8x128xi32>
      %c8_i32 = arith.constant 8 : i32
      %18 = vector.broadcast %c8_i32 : i32 to vector<8x128xi32>
      %19 = arith.cmpi slt, %17, %18 : vector<8x128xi32>
      %20 = arith.extui %19 : vector<8x128xi1> to vector<8x128xi32>
      %21 = arith.sitofp %20 : vector<8x128xi32> to vector<8x128xf32>
      %22 = arith.mulf %10, %21 : vector<8x128xf32>
      %cst_11 = arith.constant dense<0.000000e+00> : vector<128xf32>
      %23 = vector.multi_reduction <add>, %22, %cst_11 [0] : vector<8x128xf32> to vector<128xf32>
      %24 = vector.shape_cast %23 : vector<128xf32> to vector<1x128xf32>
      %cst_12 = arith.constant 1.250000e-01 : f32
      %25 = vector.broadcast %cst_12 : f32 to vector<1x128xf32>
      %26 = arith.mulf %24, %25 : vector<1x128xf32>
      %27 = vector.broadcast %26 : vector<1x128xf32> to vector<8x128xf32>
      %28 = arith.subf %10, %27 : vector<8x128xf32>
      %29 = arith.mulf %28, %28 : vector<8x128xf32>
      %30 = arith.mulf %29, %21 : vector<8x128xf32>
      %cst_13 = arith.constant dense<0.000000e+00> : vector<128xf32>
      %31 = vector.multi_reduction <add>, %30, %cst_13 [0] : vector<8x128xf32> to vector<128xf32>
      %32 = vector.shape_cast %31 : vector<128xf32> to vector<1x128xf32>
      %cst_14 = arith.constant 1.250000e-01 : f32
      %33 = vector.broadcast %cst_14 : f32 to vector<1x128xf32>
      %34 = arith.mulf %32, %33 : vector<1x128xf32>
      %cst_15 = arith.constant 9.99999974E-6 : f32
      %35 = vector.broadcast %cst_15 : f32 to vector<1x128xf32>
      %36 = arith.addf %34, %35 : vector<1x128xf32>
      %37 = math.rsqrt %36 : vector<1x128xf32>
      %38 = vector.broadcast %37 : vector<1x128xf32> to vector<8x128xf32>
      %39 = arith.mulf %28, %38 : vector<8x128xf32>
      %c0_16 = arith.constant 0 : index
      %c0_17 = arith.constant 0 : index
      %c0_18 = arith.constant 0 : index
      %40 = vector.load %arg4[%c0_16, %c0_17, %c0_18] : memref<1x1x128xf32, #tpu.memory_space<vmem>>, vector<1x1x128xf32>
      %41 = vector.shape_cast %40 : vector<1x1x128xf32> to vector<1x128xf32>
      %42 = vector.broadcast %41 : vector<1x128xf32> to vector<8x128xf32>
      %43 = arith.mulf %39, %42 : vector<8x128xf32>
      %c0_19 = arith.constant 0 : index
      %c0_20 = arith.constant 0 : index
      %c0_21 = arith.constant 0 : index
      %44 = vector.load %arg5[%c0_19, %c0_20, %c0_21] : memref<1x1x128xf32, #tpu.memory_space<vmem>>, vector<1x1x128xf32>
      %45 = vector.shape_cast %44 : vector<1x1x128xf32> to vector<1x128xf32>
      %46 = vector.broadcast %45 : vector<1x128xf32> to vector<8x128xf32>
      %47 = arith.addf %43, %46 : vector<8x128xf32>
      %cst_22 = arith.constant 0.000000e+00 : f32
      %48 = vector.broadcast %cst_22 : f32 to vector<8x128xf32>
      %49 = arith.maximumf %47, %48 : vector<8x128xf32>
      %50 = arith.truncf %49 : vector<8x128xf32> to vector<8x128xbf16>
      %c0_23 = arith.constant 0 : index
      %c0_24 = arith.constant 0 : index
      %51 = vector.load %arg7[%c0_23, %c0_24] : memref<8x128xbf16, #tpu.memory_space<vmem>>, vector<8x128xbf16>
      tpu.vector_store %arg7[%c0_23, %c0_24], %50 {strides = array<i32>} : memref<8x128xbf16, #tpu.memory_space<vmem>>, vector<8x128xbf16>,
    } else {
    }
    %c2_i32_9 = arith.constant 2 : i32
    %14 = arith.cmpi eq, %arg0, %c2_i32_9 : i32
    %15 = arith.extui %14 : i1 to i32
    %c0_i32_10 = arith.constant 0 : i32
    %16 = arith.cmpi ne, %15, %c0_i32_10 : i32
    scf.if %16 {
      %c0_11 = arith.constant 0 : index
      %c0_12 = arith.constant 0 : index
      %17 = vector.load %arg6[%c0_11, %c0_12] : memref<8x128xf32, #tpu.memory_space<vmem>>, vector<8x128xf32>
      tpu.vector_store %arg6[%c0_11, %c0_12], %10 {strides = array<i32>} : memref<8x128xf32, #tpu.memory_space<vmem>>, vector<8x128xf32>,
    } else {
    }
    return
  }
  func.func @transform_0(%arg0: i32) -> (i32, i32) {
    %c0_i32 = arith.constant 0 : i32
    %c0_i32_0 = arith.constant 0 : i32
    %c0_i32_1 = arith.constant 0 : i32
    return %c0_i32, %c0_i32_0 : i32, i32
  }
  func.func @transform_1(%arg0: i32) -> (i32, i32, i32) {
    %c0_i32 = arith.constant 0 : i32
    %c0_i32_0 = arith.constant 0 : i32
    %c0_i32_1 = arith.constant 0 : i32
    return %arg0, %c0_i32, %c0_i32_0 : i32, i32, i32
  }
  func.func @transform_2(%arg0: i32) -> (i32, i32, i32) {
    %c0_i32 = arith.constant 0 : i32
    %c0_i32_0 = arith.constant 0 : i32
    %c0_i32_1 = arith.constant 0 : i32
    return %arg0, %c0_i32, %c0_i32_0 : i32, i32, i32
  }
  func.func @transform_3(%arg0: i32) -> (i32, i32, i32) {
    %c0_i32 = arith.constant 0 : i32
    %c0_i32_0 = arith.constant 0 : i32
    %c0_i32_1 = arith.constant 0 : i32
    return %arg0, %c0_i32, %c0_i32_0 : i32, i32, i32
  }
  func.func @transform_4(%arg0: i32) -> (i32, i32, i32) {
    %c0_i32 = arith.constant 0 : i32
    %c0_i32_0 = arith.constant 0 : i32
    %c0_i32_1 = arith.constant 0 : i32
    return %arg0, %c0_i32, %c0_i32_0 : i32, i32, i32
  }
  func.func @transform_5(%arg0: i32) -> (i32, i32) {
    %c0_i32 = arith.constant 0 : i32
    %c0_i32_0 = arith.constant 0 : i32
    %c0_i32_1 = arith.constant 0 : i32
    return %c0_i32, %c0_i32_0 : i32, i32
  }
}

</mosaic_0001>

<bundles_post_ra>
// kernel: tpu_custom_call.1
= control target key start
LH: loop header
LB: loop body
LE: loop exit
PB: predicated region body
PF: predicated region fallthrough
CT: control target
= control target key end

     0   :  { %10 = vsyncpa [#allocation4], 0  ;;  %s1123_s0 = inlined_call_operand.hbm [shape: bf16[8,128], index: 0, kind: input, shape index: {}]   ;;  %s1124_s1 = inlined_call_operand.hbm [shape: bf16[3,128,128], index: 1, kind: input, shape index: {}]   ;;  %s1125_s2 = inlined_call_operand.vmem [shape: f32[3,1,128], index: 2, kind: input, shape index: {}]   ;;  %s1126_s3 = inlined_call_operand.hbm [shape: f32[3,1,128], index: 3, kind: input, shape index: {}]   ;;  %s1127_s4 = inlined_call_operand.vmem [shape: f32[3,1,128], index: 4, kind: input, shape index: {}]   ;;  %s1128_s5 = inlined_call_operand.hbm [shape: f32[8,128], index: 5, kind: output, shape index: {}]  }
   0x1   :  { %11 = vsyncpa [#allocation7], 0 }
   0x2   :  { %13 = vsyncpa [#allocation7 + $0x1], 0 }
   0x3   :  { %14 = vsyncpa [#allocation5], 0  ;;  %s903_s18 = smov 0   ;;  %s905_s19 = smov 0  }
   0x4   :  { %s907_s20 = smov 0   ;;  %s909_s21 = smov 0  }
   0x5 LB: > { %s924_s22 = sadd.s32 1, %s863_s21   ;;  %s48_s23 = sadd.s32 1, %s859_s20  ;;  %s863_s21 = sphi %s909_s21, %s1146_s21   ;;  %s859_s20 = sphi %s907_s20, %s1145_s20   ;;  %s855_s19 = sphi %s905_s19, %s1144_s19   ;;  %s851_s18 = sphi %s903_s18, %s1143_s18  }
   0x6   : > { %s45_s24 = ssub.s32 %s863_s21, %s924_s22  ;;  %p55_p0 = scmp.ne.s32.totalorder %s859_s20, %s855_s19 }
   0x7   : > { %p46_p1 = scmp.eq.s32.totalorder %s45_s24, 0  ;;  %p56_p2 = scmp.eq.s32.totalorder %s863_s21, 0 }
   0x8   : > { %p663_p3 = scmp.lt.s32.totalorder %s863_s21, 3  ;;  %s195_s26 = sand.u32 1, %s863_s21  }
   0x9   : > { %s934_s25 = scalar_select %p46_p1, %s859_s20, %s48_s23  }
   0xa   : > { %p57_p4 = por %p56_p2, %p55_p0  ;;  %s197_s27 = sand.u32 1, %s859_s20  }
   0xb   : > { %s584_s28 = sshll.u32 %s197_s27, 6  ;;  %s609_s29 = sshll.u32 %s863_s21, 10 }
   0xc   : > { %s944_s7 = scalar_lea.hbm %s1124_s1, %s609_s29  ;;  %s199_s8 = scalar_lea.vmem [#allocation6], %s584_s28 }
   0xd   : > { %s206_s9 = sshll.u32 %s199_s8, 4  ;;  %p946_p5 = pnand %p663_p3, %p57_p4  ;;  %s950_s9 = int_to_ptr.vmem [resolvable:$true] %s206_s9 }
   0xe   : > { %s952_s11 = scalar_lea.sflag [#allocation7], %s195_s26  ;;  %s715_s12 = scalar_lea.hbm %s944_s7, 1024 }
   0xf   : > { %p716_p6 = scmp.ne.s32.totalorder %s944_s7, %s715_s12  ;;  %p717_p7 = pneg %p946_p5 }
  0x10   : > { %s720_s15 = scalar_lea.hbm %s1124_s1, 3072  ;;  %p721_p10 = scmp.lt.s32.totalorder %s944_s7, %s1124_s1 }
  0x11   : > { %p718_p8 = pnand %p717_p7, %p716_p6  ;;  %p722_p11 = scmp.lt.s32.totalorder %s720_s15, %s715_s12 }
  0x13   : > { %p719_p9 = pneg %p718_p8  ;;  %p723_p12 = por %p722_p11, %p721_p10 }
  0x15   : > { %p724_p13 = pnand %p723_p12, %p719_p9 }
  0x17   : > { %727 = shalt.err (!%p724_p13)
}
  0x18   : > { %s728_s23 = scalar_lea.vmem %s950_s9, 1024  ;;  %s865_s24 = smov [#allocation6]  }
  0x19   : > { %p729_p0 = scmp.ne.s32.totalorder %s950_s9, %s728_s23  ;;  %s733_s26 = sshll.u32 %s865_s24, 4  ;;  %s734_s26 = int_to_ptr.vmem [resolvable:$false] %s733_s26 }
  0x1a   : > { %s735_s28 = scalar_lea.vmem %s734_s26, 2048  ;;  %p736_p3 = scmp.lt.s32.totalorder %s950_s9, %s734_s26 }
  0x1b   : > { %p731_p1 = pnand %p729_p0, %p717_p7  ;;  %p737_p4 = scmp.lt.s32.totalorder %s735_s28, %s728_s23 }
  0x1d   : > { %p732_p2 = pneg %p731_p1  ;;  %p738_p6 = por %p737_p4, %p736_p3 }
  0x1f   : > { %p739_p8 = pnand %p738_p6, %p732_p2 }
  0x21   : > { %742 = shalt.err (!%p739_p8)
}
  0x22   : > { %s866_s29 = smov 64   ;;  %s867_s30 = smov 4  }
  0x23   : > { %658 = dma.hbm_to_vmem [thread:$0]  (!%p946_p5), %s944_s7, 1024, %s950_s9, %s952_s11, %s866_s29, %s866_s29, %s867_s30  }
  0x24   : > { %s980_s6 = sadd.s32 4294967295, %s863_s21   ;;  %p61_p10 = scmp.ne.s32.totalorder %s855_s19, %s851_s18 }
  0x25   : > { %p1129_p9 = scmp.eq.s32.totalorder %s980_s6, 0  ;;  %p581_p11 = scmp.ge.s32.totalorder %s863_s21, 1 }
  0x26   : > { %p171_p12 = scmp.lt.s32.totalorder %s863_s21, 4  ;;  %s868_s7 = smov [#allocation3]  }
  0x27   : > { %p990_p0 = por %p1129_p9, %p61_p10  ;;  %s184_s9 = sshll.u32 %s868_s7, 4  ;;  %s998_s9 = int_to_ptr.vmem [resolvable:$true] %s184_s9 }
  0x28   : > { %p994_p1 = pnand %p581_p11, %p171_p12  ;;  %s587_s18 = sshll.u32 %s863_s21, 4 }
  0x29   : > { %s1134_s8 = scalar_select %p990_p0, 1, 0 }
  0x2a   : > { %s1135_s12 = scalar_select %p994_p1, 1, 0 }
  0x2b   : > { %p651_p2 = pneg %p994_p1  ;;  %s1006_s15 = scalar_lea.hbm %s1126_s3, %s587_s18 }
  0x2c   : > { %s225_s16 = scalar_lea.vmem [#allocation8], %s197_s27  ;;  %s743_s24 = scalar_lea.hbm %s1006_s15, 16 }
  0x2d   : > { %s232_s17 = sshll.u32 %s225_s16, 4  ;;  %p1012_p3 = pnand %p651_p2, %p1129_p9  ;;  %s233_s17 = int_to_ptr.vmem [resolvable:$true] %s232_s17 }
  0x2e   : > { %p744_p4 = scmp.ne.s32.totalorder %s1006_s15, %s743_s24  ;;  %s748_s28 = scalar_lea.hbm %s1126_s3, 48 }
  0x2f   : > { %s1136_s23 = scalar_select %p1012_p3, 1, 0 }
  0x30   : > { %p746_p6 = pnand %p744_p4, %p717_p7  ;;  %p749_p10 = scmp.lt.s32.totalorder %s1006_s15, %s1126_s3 }
  0x31   : > { %p750_p11 = scmp.lt.s32.totalorder %s748_s28, %s743_s24 }
  0x32   : > { %p747_p8 = pneg %p746_p6 }
  0x33   : > { %p751_p12 = por %p750_p11, %p749_p10 }
  0x35   : > { %p752_p2 = pnand %p751_p12, %p747_p8 }
  0x37   : > { %755 = shalt.err (!%p752_p2)
}
  0x38   : > { %s756_s27 = scalar_lea.vmem %s233_s17, 16  ;;  %s869_s7 = smov [#allocation8]  }
  0x39   : > { %p757_p13 = scmp.ne.s32.totalorder %s233_s17, %s756_s27  ;;  %s761_s18 = sshll.u32 %s869_s7, 4  ;;  %s762_s18 = int_to_ptr.vmem [resolvable:$false] %s761_s18 }
  0x3a   : > { %s763_s13 = scalar_lea.vmem %s762_s18, 32  ;;  %p764_p6 = scmp.lt.s32.totalorder %s233_s17, %s762_s18 }
  0x3b   : > { %p759_p9 = pnand %p757_p13, %p717_p7  ;;  %p765_p0 = scmp.lt.s32.totalorder %s763_s13, %s756_s27 }
  0x3d   : > { %p760_p4 = pneg %p759_p9  ;;  %p766_p1 = por %p765_p0, %p764_p6 }
  0x3f   : > { %p767_p3 = pnand %p766_p1, %p760_p4 }
  0x41   : > { %770 = shalt.err (!%p767_p3)
}
  0x42   : > { %661 = dma.hbm_to_vmem [thread:$0]  (!%p946_p5), %s1006_s15, 16, %s233_s17, %s952_s11  }
  0x43   : > { %p1137_p7 = scmp.ne.s32.totalorder %s1136_s23, 0  ;;  %s782_s14 = scalar_lea.vmem %s998_s9, 64 }
  0x44   : > { %p783_p13 = scmp.ne.s32.totalorder %s998_s9, %s782_s14  ;;  %p790_p11 = scmp.lt.s32.totalorder %s998_s9, %s998_s9 }
  0x45   : > { %p773_p9 = pneg %p1137_p7  ;;  %p791_p0 = scmp.lt.s32.totalorder %s782_s14, %s782_s14 }
  0x47   : > { %p785_p8 = pnand %p783_p13, %p773_p9  ;;  %p792_p1 = por %p791_p0, %p790_p11 }
  0x49   : > { %p786_p10 = pneg %p785_p8 }
  0x4b   : > { %p793_p3 = pnand %p792_p1, %p786_p10 }
  0x4d   : > { %796 = shalt.err (!%p793_p3)
}
  0x4e   : > { %654 = dma.hbm_to_vmem [thread:$0]  (!%p1137_p7), %s1123_s0, 64, %s998_s9, [#allocation4]  }
  0x4f   : > { %p1138_p5 = scmp.ne.s32.totalorder %s1135_s12, 0 }
  0x50   : > { %p1139_p12 = scmp.eq.s32.totalorder (!%p1138_p5), %s980_s6, 0 }
  0x51   : > { %247 = sbr.rel (%p1138_p5) target bundleno = 416 (0x1a0), region = 40 }
  0x56   : > { %838 = dma.done.wait (%p1139_p12), [#allocation4], 64   ;;  %p1140_p2 = pmov %p1139_p12 }
  0x57   : > { %s253_s11 = sand.u32 1, %s980_s6   ;;  %s255_s15 = sand.u32 1, %s855_s19  }
  0x58   : > { %840 = vsyncadd (%p1140_p2), [#allocation4], 4294967232  ;;  %s590_s17 = sshll.u32 %s255_s15, 6  ;;  %s254_s23 = scalar_lea.sflag [#allocation7], %s253_s11 }
  0x59   : > { %s1055_s24 = scalar_lea.vmem [#allocation6], %s590_s17  ;;  %p1141_p4 = scmp.ne.s32.totalorder %s1134_s8, 0 }
  0x5b   : > { %842 = dma.done.wait (%p1141_p4), %s254_s23, 1040  }
  0x5c   : > { %844 = vsyncadd (%p1141_p4), %s254_s23, 4294966256  ;;  %p297_p6 = scmp.lt.s32.totalorder %s980_s6, 2  ;;  %s1073_s27 = scalar_lea.vmem [#allocation8], %s255_s15 }
  0x5d   : > { %p1142_p7 = scmp.ne.s32.totalorder %s980_s6, 0 }
  0x5e   : > { %s1063_s12 = scalar_select %p297_p6, %s980_s6, 2 }
  0x5f   : > { %307 = sbr.rel (%p1142_p7) target bundleno = 102 (0x66), region = 56 }
  0x60   : > { %s299_s26 = scalar_lea.vmem %s1125_s2, %s1063_s12  ;;  %s302_s30 = scalar_lea.vmem %s1127_s4, %s1063_s12 }
  0x64   : > { %v308_v0 = vld [vmem:[#allocation3] sm:$0xf] }
  0x65   : > { %309 = vst [vmem:[#allocation2] sm:$0xf] %v308_v0 }
  0x66 PF: > { %v705_v1 = vld [vmem:[%s1055_s24 + $0x38] sm:$0xff]   ;;  %v870_v2 = vmov 0.0   ;;  %v706_v3 = vld [vmem:[%s1055_s24 + $0x30] sm:$0xff]   ;;  %vm871_vm0 = vmmov 0   ;;  %v707_v4 = vld [vmem:[%s1055_s24 + $0x28] sm:$0xff]   ;;  %p601_p9 = scmp.ge.s32.totalorder %s980_s6, 2 }
  0x67   : > { %619 = vmatprep.subr.bf16.mxu0 %v870_v2  ;;  %635 = vmatprep.mubr.msk.bf16.mxu0 %vm871_vm0, %v870_v2  ;;  %v708_v5 = vld [vmem:[%s1055_s24 + $0x20] sm:$0xff]   ;;  %v709_v6 = vld [vmem:[%s1055_s24 + $0x18] sm:$0xff]   ;;  %v710_v7 = vld [vmem:[%s1055_s24 + $0x10] sm:$0xff]  }
  0x68   : > { %620 = vmatpush3.bf16.msra.mxu0 %v705_v1  ;;  %v711_v8 = vld [vmem:[%s1055_s24 + $0x8] sm:$0xff]   ;;  %v712_v9 = vld [vmem:[%s1055_s24] sm:$0xff]   ;;  %v592_v11 = vld [vmem:[%s299_s26] ss:$0 sm:$0xff] }
  0x69   : > { %621 = vmatprep.subr.bf16.mxu0 %v870_v2 }
  0x6c   : > { %622 = vmatpush3.bf16.msra.mxu0 %v706_v3  ;;  %v310_v10 = vld [vmem:[#allocation2] sm:$0xf] }
  0x6d   : > { %623 = vmatprep.subr.bf16.mxu0 %v870_v2 }
  0x70   : > { %624 = vmatpush3.bf16.msra.mxu0 %v707_v4 }
  0x71   : > { %625 = vmatprep.subr.bf16.mxu0 %v870_v2 }
  0x74   : > { %626 = vmatpush3.bf16.msra.mxu0 %v708_v5 }
  0x75   : > { %627 = vmatprep.subr.bf16.mxu0 %v870_v2 }
  0x78   : > { %628 = vmatpush3.bf16.msra.mxu0 %v709_v6 }
  0x79   : > { %629 = vmatprep.subr.bf16.mxu0 %v870_v2 }
  0x7c   : > { %630 = vmatpush3.bf16.msra.mxu0 %v710_v7 }
  0x7d   : > { %631 = vmatprep.subr.bf16.mxu0 %v870_v2 }
  0x80   : > { %632 = vmatpush3.bf16.msra.mxu0 %v711_v8 }
  0x81   : > { %633 = vmatprep.subr.bf16.mxu0 %v870_v2 }
  0x84   : > { %634 = vmatpush3.bf16.msra.mxu0 %v712_v9 }
  0x87   : > { %636 = vmatmul.mubr.bf16.vlgmr.msra.gmra.mxu0 %v310_v10 }
 0x147   : > { %v416_v12 = vpop.f32.mrf.mxu0 }
 0x148   : > { %v417_v13 = vadd.f32 %v592_v11, %v416_v12 }
 0x149   : > { %v637_v14 = vpop.f32.mrf.mxu0  ;;  %425 = sbr.rel (%p601_p9) target bundleno = 393 (0x189), region = 60 }
 0x14b   : > { %v419_v15 = vpop.f32.mrf.mxu0 }
 0x14d   : > { %v638_v16 = vpop.f32.mrf.mxu0 }
 0x14e   : > { %v432_v17 = vrot.slane %v417_v13, 4  ;;  %v602_v35 = vld [vmem:[%s1073_s27] ss:$0 sm:$0xff] }
 0x14f   : > { %v603_v37 = vld [vmem:[%s302_s30] ss:$0 sm:$0xff] }
 0x150   : > { %v433_v18 = vadd.f32 %v432_v17, %v417_v13 }
 0x152   : > { %v434_v19 = vrot.slane %v433_v18, 2 }
 0x154   : > { %v435_v20 = vadd.f32 %v434_v19, %v433_v18 }
 0x156   : > { %v436_v21 = vrot.slane %v435_v20, 1 }
 0x158   : > { %v437_v22 = vadd.f32 %v436_v21, %v435_v20 }
 0x15a   : > { %v438_v23 = vmul.f32 0.125, %v437_v22 }
 0x15c   : > { %v439_v24 = vsub.f32 %v417_v13, %v438_v23 }
 0x15e   : > { %v440_v25 = vmul.f32 %v439_v24, %v439_v24 }
 0x160   : > { %v442_v26 = vrot.slane %v440_v25, 4 }
 0x162   : > { %v443_v27 = vadd.f32 %v442_v26, %v440_v25 }
 0x164   : > { %v444_v28 = vrot.slane %v443_v27, 2 }
 0x166   : > { %v445_v29 = vadd.f32 %v444_v28, %v443_v27 }
 0x168   : > { %v446_v30 = vrot.slane %v445_v29, 1 }
 0x16a   : > { %v447_v31 = vadd.f32 %v446_v30, %v445_v29 }
 0x16c   : > { %v448_v32 = vmul.f32 0.125, %v447_v31 }
 0x16e   : > { %v449_v33 = vadd.f32 1e-05, %v448_v32 }
 0x170   : > { %713 = vrsqrt.f32 %v449_v33 }
 0x17d   : > { %v714_v34 = vpop.eup %713 }
 0x17e   : > { %v451_v36 = vmul.f32 %v714_v34, %v439_v24 }
 0x180   : > { %v459_v38 = vmul.f32 %v602_v35, %v451_v36 }
 0x182   : > { %v467_v39 = vadd.f32 %v603_v37, %v459_v38 }
 0x184   : > { %v468_v40 = vmax.f32 %v467_v39, 0.0 }
 0x186   : > { %v469_v41 = vpack.c.bf16 %v468_v40, %v468_v40 }
 0x188   : > { %470 = vst [vmem:[#allocation2] sm:$0xf] %v469_v41 }
 0x189 PF: > { %p604_p13 = scmp.ne.s32.totalorder %s980_s6, 2 }
 0x18b   : > { %474 = sbr.rel (%p604_p13) target bundleno = 401 (0x191), region = 64 }
 0x190   : > { %475 = vst [vmem:[#allocation9] sm:$0xff] %v417_v13 }
 0x191 PF: > { %p665_p8 = scmp.eq.s32.totalorder %s980_s6, 2  ;;  %s872_s14 = smov [#allocation9]  }
 0x192   : > { %s483_s10 = sshll.u32 %s872_s14, 4  ;;  %s484_s10 = int_to_ptr.vmem [resolvable:$true] %s483_s10 }
 0x193   : > { %s797_s16 = scalar_lea.vmem %s484_s10, 128  ;;  %p804_p1 = scmp.lt.s32.totalorder %s484_s10, %s484_s10 }
 0x194   : > { %p798_p10 = scmp.ne.s32.totalorder %s484_s10, %s797_s16  ;;  %p805_p3 = scmp.lt.s32.totalorder %s797_s16, %s797_s16 }
 0x196   : > { %p799_p11 = pnand %p798_p10, %p665_p8  ;;  %p806_p5 = por %p805_p3, %p804_p1 }
 0x198   : > { %p800_p0 = pneg %p799_p11 }
 0x19a   : > { %p807_p12 = pnand %p806_p5, %p800_p0 }
 0x19c   : > { %810 = shalt.err (!%p807_p12)
}
 0x19d   : > { %648 = dma.vmem_to_hbm [thread:$0]  (%p665_p8), %s484_s10, 128, %s1128_s5, [#allocation5]  }
 0x19e   : > { %846 = dma.done.wait (%p665_p8), [#allocation5], 128  }
 0x19f   : > { %848 = vsyncadd (%p665_p8), [#allocation5], 4294967168 }
 0x1a0 PF: > { %p17_p2 = scmp.ge.s32.totalorder %s924_s22, 5   ;;  %s1143_s18 = smov %s855_s19 }
 0x1a1   : > { %s1144_s19 = smov %s859_s20  ;;  %s1145_s20 = smov %s934_s25 }
 0x1a2   : > { %s1146_s21 = smov %s924_s22  ;;  %19 = sbr.rel (!%p17_p2) target bundleno = 5 (0x5), region = 111 }
 0x1a7   :  { %496 = vsyncpa [#allocation4], 1 }
 0x1a8   :  { %498 = vsyncpa [#allocation4 + $0x1], 1 }
 0x1a9   :  { %499 = vsyncpa [#allocation7], 1 }
 0x1aa   :  { %501 = vsyncpa [#allocation7 + $0x1], 1 }
 0x1ab   :  { %502 = vsyncpa [#allocation5], 1 }
 0x1ac   :  { %504 = vsyncpa [#allocation5 + $0x1], 1 }

</bundles_post_ra>
